<compile_context>
chip_gen: v6e
topology: v6e:2x2x1
jax: 0.10.0
libtpu: 0.0.40
codegen_flags: <defaults>
</compile_context>

<pallas_src>
import jax
import jax.numpy as jnp
from jax import lax
from jax.experimental import pallas as pl
from jax.experimental.pallas import tpu as pltpu


def wave_conv_bn_relu_kernel(x_ref, w_ref, b_ref, g_ref, beta_ref, o_ref):
    # x_ref:    (N, C_in, T)        input
    # w_ref:    (C_out, 3*C_in)     conv weights, k = dt*C_in + ci  (dt=0 -> x[t-1] tap)
    # b_ref:    (C_out, 1)          conv bias
    # g_ref:    (C_out, 1)          BN gamma
    # beta_ref: (C_out, 1)          BN beta
    # o_ref:    (N, C_out, T)       output
    n_b, c_in, t = x_ref.shape
    eps = 1e-5

    w = w_ref[...]                                   # hoisted out of the batch loop
    b = b_ref[...]

    # Boundary masks for padding=1 (hoisted: independent of the batch index).
    lane = lax.broadcasted_iota(jnp.int32, (c_in, t), 1)
    left_edge = lane == 0
    right_edge = lane == (t - 1)

    # --- Conv1d as one K=3*C_in matmul per batch element (im2col along sublanes) ---
    ys = []
    for n in range(n_b):                             # static unroll; N is tiny
        xn = x_ref[n]                                # (C_in, T)
        # roll(+1)[t] = x[t-1] (tap dt=0), roll(T-1)[t] = x[t+1] (tap dt=2); wraparound masked to 0.
        x_lm = jnp.where(left_edge, 0.0, pltpu.roll(xn, shift=1, axis=1))
        x_rm = jnp.where(right_edge, 0.0, pltpu.roll(xn, shift=t - 1, axis=1))
        patches = jnp.concatenate([x_lm, xn, x_rm], axis=0)        # (3*C_in, T)
        y = jnp.dot(w, patches, preferred_element_type=jnp.float32) + b   # (C_out, T)
        ys.append(y)

    # --- BatchNorm1d (training mode) over (N, T) per channel: two-pass, lane reductions ---
    m = float(n_b * t)
    mean = sum(jnp.sum(y, axis=1, keepdims=True) for y in ys) / m              # (C_out, 1)
    var = sum(jnp.sum((y - mean) ** 2, axis=1, keepdims=True) for y in ys) / m  # biased var
    scale = lax.rsqrt(var + eps) * g_ref[...]                                   # (C_out, 1)
    shift = beta_ref[...] - mean * scale

    # --- normalize + LeakyReLU(0.01), write lane-dense (C_out, T) slabs ---
    for n in range(n_b):
        z = ys[n] * scale + shift
        o_ref[n] = jnp.where(z >= 0, z, 0.01 * z).astype(o_ref.dtype)


def wave_conv_layer(x, conv_w, conv_b, bn_gamma, bn_beta):
    n, c_in, t = x.shape
    c_out = conv_w.shape[0]
    # Host-side glue on tiny parameter tensors only (no HBM pass over activations):
    #   (C_out, C_in, 3) -> (C_out, 3*C_in) with k = dt*C_in + ci.
    w2 = jnp.transpose(conv_w, (0, 2, 1)).reshape(c_out, 3 * c_in)
    b2 = conv_b.reshape(c_out, 1)
    g2 = bn_gamma.reshape(c_out, 1)
    bt2 = bn_beta.reshape(c_out, 1)

    return pl.pallas_call(
        wave_conv_bn_relu_kernel,
        out_shape=jax.ShapeDtypeStruct((n, c_out, t), jnp.float32),
        # No grid: the whole (small) problem is one VMEM-resident block; default BlockSpecs
        # place full arrays in VMEM. Explicit limit keeps this portable across v5e/v6e/v7x.
        compiler_params=pltpu.CompilerParams(vmem_limit_bytes=32 * 1024 * 1024),
    )(x, w2, b2, g2, bt2)


def reference(x, conv_w, conv_b, gamma, beta):
    """Pure-JAX replica of the PyTorch forward (training-mode BatchNorm, LeakyReLU(0.01))."""
    n, c_in, t = x.shape
    xp = jnp.pad(x, ((0, 0), (0, 0), (1, 1)))
    patches = jnp.stack([xp[:, :, dt:dt + t] for dt in range(3)], axis=2)   # (N, C_in, 3, T)
    y = jnp.einsum("oid,nidt->not", conv_w, patches) + conv_b[None, :, None]
    mean = jnp.mean(y, axis=(0, 2), keepdims=True)
    var = jnp.mean((y - mean) ** 2, axis=(0, 2), keepdims=True)
    z = (y - mean) * lax.rsqrt(var + 1e-5) * gamma[None, :, None] + beta[None, :, None]
    return jnp.where(z >= 0, z, 0.01 * z)


if __name__ == "__main__":
    # Small shapes consistent with the module: n_batch=2, in_channels=4, timesteps=128
    # (T chosen lane-dense), out_channels = 2 * in_channels = 8.
    N, C_IN, T = 2, 4, 128
    C_OUT = 2 * C_IN

    key = jax.random.PRNGKey(0)
    kx, kw, kb, kg, kbt = jax.random.split(key, 5)
    x = jax.random.normal(kx, (N, C_IN, T), dtype=jnp.float32)
    conv_w = 0.1 * jax.random.normal(kw, (C_OUT, C_IN, 3), dtype=jnp.float32)
    conv_b = 0.1 * jax.random.normal(kb, (C_OUT,), dtype=jnp.float32)
    bn_gamma = 1.0 + 0.1 * jax.random.normal(kg, (C_OUT,), dtype=jnp.float32)
    bn_beta = 0.1 * jax.random.normal(kbt, (C_OUT,), dtype=jnp.float32)

    out = jax.block_until_ready(wave_conv_layer(x, conv_w, conv_b, bn_gamma, bn_beta))

    ref = reference(x, conv_w, conv_b, bn_gamma, bn_beta)
    assert out.shape == (N, C_OUT, T), out.shape
    assert jnp.allclose(out, ref, rtol=1e-3, atol=1e-3), float(jnp.max(jnp.abs(out - ref)))
    print("KERNEL_OK")
</pallas_src>

<mosaic_0001>
module attributes {stable_mosaic.version = 11 : i64} {
  func.func @wave_conv_bn_relu_kernel(%arg0: memref<2x4x128xf32, #tpu.memory_space<vmem>>, %arg1: memref<8x12xf32, #tpu.memory_space<vmem>>, %arg2: memref<8x1xf32, #tpu.memory_space<vmem>>, %arg3: memref<8x1xf32, #tpu.memory_space<vmem>>, %arg4: memref<8x1xf32, #tpu.memory_space<vmem>>, %arg5: memref<2x8x128xf32, #tpu.memory_space<vmem>>) attributes {dimension_semantics = [], scalar_prefetch = 0 : i64, scratch_operands = 0 : i64, tpu.core_type = #tpu.core_type<tc>} {
    %c0 = arith.constant 0 : index
    %c0_0 = arith.constant 0 : index
    %0 = vector.load %arg1[%c0, %c0_0] : memref<8x12xf32, #tpu.memory_space<vmem>>, vector<8x12xf32>
    %c0_1 = arith.constant 0 : index
    %c0_2 = arith.constant 0 : index
    %1 = vector.load %arg2[%c0_1, %c0_2] : memref<8x1xf32, #tpu.memory_space<vmem>>, vector<8x1xf32>
    %2 = tpu.iota {dimensions = array<i32: 1>} : vector<4x128xi32>
    %c0_i32 = arith.constant 0 : i32
    %3 = vector.broadcast %c0_i32 : i32 to vector<4x128xi32>
    %4 = arith.cmpi eq, %2, %3 : vector<4x128xi32>
    %c127_i32 = arith.constant 127 : i32
    %5 = vector.broadcast %c127_i32 : i32 to vector<4x128xi32>
    %6 = arith.cmpi eq, %2, %5 : vector<4x128xi32>
    %c0_3 = arith.constant 0 : index
    %c0_4 = arith.constant 0 : index
    %c0_5 = arith.constant 0 : index
    %7 = vector.load %arg0[%c0_3, %c0_4, %c0_5] : memref<2x4x128xf32, #tpu.memory_space<vmem>>, vector<1x4x128xf32>
    %8 = vector.shape_cast %7 : vector<1x4x128xf32> to vector<4x128xf32>
    %c1_i32 = arith.constant 1 : i32
    %9 = tpu.dynamic_rotate %8 by %c1_i32 dim 1 : vector<4x128xf32>, i32 -> vector<4x128xf32>
    %cst = arith.constant 0.000000e+00 : f32
    %10 = vector.broadcast %cst : f32 to vector<4x128xf32>
    %11 = arith.select %4, %10, %9 : vector<4x128xi1>, vector<4x128xf32>
    %c127_i32_6 = arith.constant 127 : i32
    %12 = tpu.dynamic_rotate %8 by %c127_i32_6 dim 1 : vector<4x128xf32>, i32 -> vector<4x128xf32>
    %cst_7 = arith.constant 0.000000e+00 : f32
    %13 = vector.broadcast %cst_7 : f32 to vector<4x128xf32>
    %14 = arith.select %6, %13, %12 : vector<4x128xi1>, vector<4x128xf32>
    %15 = tpu.concatenate %11, %8, %14 in 0 : vector<4x128xf32>, vector<4x128xf32>, vector<4x128xf32> -> vector<12x128xf32>
    %cst_8 = arith.constant dense<0.000000e+00> : vector<8x128xf32>
    %16 = tpu.matmul %0, %15, %cst_8 {dimension_numbers = #tpu.dot_dimension_numbers<[1], [0], [0], [1], [0, 0, 1, 1], [], []>} : vector<8x12xf32>, vector<12x128xf32>, vector<8x128xf32> -> vector<8x128xf32>
    %17 = vector.broadcast %1 : vector<8x1xf32> to vector<8x128xf32>
    %18 = arith.addf %16, %17 : vector<8x128xf32>
    %c1 = arith.constant 1 : index
    %c0_9 = arith.constant 0 : index
    %c0_10 = arith.constant 0 : index
    %19 = vector.load %arg0[%c1, %c0_9, %c0_10] : memref<2x4x128xf32, #tpu.memory_space<vmem>>, vector<1x4x128xf32>
    %20 = vector.shape_cast %19 : vector<1x4x128xf32> to vector<4x128xf32>
    %c1_i32_11 = arith.constant 1 : i32
    %21 = tpu.dynamic_rotate %20 by %c1_i32_11 dim 1 : vector<4x128xf32>, i32 -> vector<4x128xf32>
    %cst_12 = arith.constant 0.000000e+00 : f32
    %22 = vector.broadcast %cst_12 : f32 to vector<4x128xf32>
    %23 = arith.select %4, %22, %21 : vector<4x128xi1>, vector<4x128xf32>
    %c127_i32_13 = arith.constant 127 : i32
    %24 = tpu.dynamic_rotate %20 by %c127_i32_13 dim 1 : vector<4x128xf32>, i32 -> vector<4x128xf32>
    %cst_14 = arith.constant 0.000000e+00 : f32
    %25 = vector.broadcast %cst_14 : f32 to vector<4x128xf32>
    %26 = arith.select %6, %25, %24 : vector<4x128xi1>, vector<4x128xf32>
    %27 = tpu.concatenate %23, %20, %26 in 0 : vector<4x128xf32>, vector<4x128xf32>, vector<4x128xf32> -> vector<12x128xf32>
    %cst_15 = arith.constant dense<0.000000e+00> : vector<8x128xf32>
    %28 = tpu.matmul %0, %27, %cst_15 {dimension_numbers = #tpu.dot_dimension_numbers<[1], [0], [0], [1], [0, 0, 1, 1], [], []>} : vector<8x12xf32>, vector<12x128xf32>, vector<8x128xf32> -> vector<8x128xf32>
    %29 = vector.broadcast %1 : vector<8x1xf32> to vector<8x128xf32>
    %30 = arith.addf %28, %29 : vector<8x128xf32>
    %cst_16 = arith.constant dense<0.000000e+00> : vector<8xf32>
    %31 = vector.multi_reduction <add>, %18, %cst_16 [1] : vector<8x128xf32> to vector<8xf32>
    %32 = vector.shape_cast %31 : vector<8xf32> to vector<8x1xf32>
    %cst_17 = arith.constant 0.000000e+00 : f32
    %33 = vector.broadcast %cst_17 : f32 to vector<8x1xf32>
    %34 = arith.addf %33, %32 : vector<8x1xf32>
    %cst_18 = arith.constant dense<0.000000e+00> : vector<8xf32>
    %35 = vector.multi_reduction <add>, %30, %cst_18 [1] : vector<8x128xf32> to vector<8xf32>
    %36 = vector.shape_cast %35 : vector<8xf32> to vector<8x1xf32>
    %37 = arith.addf %34, %36 : vector<8x1xf32>
    %cst_19 = arith.constant 2.560000e+02 : f32
    %38 = vector.broadcast %cst_19 : f32 to vector<8x1xf32>
    %39 = arith.divf %37, %38 : vector<8x1xf32>
    %40 = vector.broadcast %39 : vector<8x1xf32> to vector<8x128xf32>
    %41 = arith.subf %18, %40 : vector<8x128xf32>
    %42 = arith.mulf %41, %41 : vector<8x128xf32>
    %cst_20 = arith.constant dense<0.000000e+00> : vector<8xf32>
    %43 = vector.multi_reduction <add>, %42, %cst_20 [1] : vector<8x128xf32> to vector<8xf32>
    %44 = vector.shape_cast %43 : vector<8xf32> to vector<8x1xf32>
    %cst_21 = arith.constant 0.000000e+00 : f32
    %45 = vector.broadcast %cst_21 : f32 to vector<8x1xf32>
    %46 = arith.addf %45, %44 : vector<8x1xf32>
    %47 = vector.broadcast %39 : vector<8x1xf32> to vector<8x128xf32>
    %48 = arith.subf %30, %47 : vector<8x128xf32>
    %49 = arith.mulf %48, %48 : vector<8x128xf32>
    %cst_22 = arith.constant dense<0.000000e+00> : vector<8xf32>
    %50 = vector.multi_reduction <add>, %49, %cst_22 [1] : vector<8x128xf32> to vector<8xf32>
    %51 = vector.shape_cast %50 : vector<8xf32> to vector<8x1xf32>
    %52 = arith.addf %46, %51 : vector<8x1xf32>
    %cst_23 = arith.constant 2.560000e+02 : f32
    %53 = vector.broadcast %cst_23 : f32 to vector<8x1xf32>
    %54 = arith.divf %52, %53 : vector<8x1xf32>
    %cst_24 = arith.constant 9.99999974E-6 : f32
    %55 = vector.broadcast %cst_24 : f32 to vector<8x1xf32>
    %56 = arith.addf %54, %55 : vector<8x1xf32>
    %57 = math.rsqrt %56 : vector<8x1xf32>
    %c0_25 = arith.constant 0 : index
    %c0_26 = arith.constant 0 : index
    %58 = vector.load %arg3[%c0_25, %c0_26] : memref<8x1xf32, #tpu.memory_space<vmem>>, vector<8x1xf32>
    %59 = arith.mulf %57, %58 : vector<8x1xf32>
    %c0_27 = arith.constant 0 : index
    %c0_28 = arith.constant 0 : index
    %60 = vector.load %arg4[%c0_27, %c0_28] : memref<8x1xf32, #tpu.memory_space<vmem>>, vector<8x1xf32>
    %61 = arith.mulf %39, %59 : vector<8x1xf32>
    %62 = arith.subf %60, %61 : vector<8x1xf32>
    %63 = vector.broadcast %59 : vector<8x1xf32> to vector<8x128xf32>
    %64 = arith.mulf %18, %63 : vector<8x128xf32>
    %65 = vector.broadcast %62 : vector<8x1xf32> to vector<8x128xf32>
    %66 = arith.addf %64, %65 : vector<8x128xf32>
    %cst_29 = arith.constant 0.000000e+00 : f32
    %67 = vector.broadcast %cst_29 : f32 to vector<8x128xf32>
    %68 = arith.cmpf oge, %66, %67 : vector<8x128xf32>
    %cst_30 = arith.constant 0.00999999977 : f32
    %69 = vector.broadcast %cst_30 : f32 to vector<8x128xf32>
    %70 = arith.mulf %69, %66 : vector<8x128xf32>
    %71 = arith.select %68, %66, %70 : vector<8x128xi1>, vector<8x128xf32>
    %c0_31 = arith.constant 0 : index
    %c0_32 = arith.constant 0 : index
    %c0_33 = arith.constant 0 : index
    %72 = vector.load %arg5[%c0_31, %c0_32, %c0_33] : memref<2x8x128xf32, #tpu.memory_space<vmem>>, vector<1x8x128xf32>
    %73 = vector.shape_cast %72 : vector<1x8x128xf32> to vector<8x128xf32>
    %74 = vector.shape_cast %71 : vector<8x128xf32> to vector<1x8x128xf32>
    tpu.vector_store %arg5[%c0_31, %c0_32, %c0_33], %74 {strides = array<i32>} : memref<2x8x128xf32, #tpu.memory_space<vmem>>, vector<1x8x128xf32>,
    %75 = vector.broadcast %59 : vector<8x1xf32> to vector<8x128xf32>
    %76 = arith.mulf %30, %75 : vector<8x128xf32>
    %77 = vector.broadcast %62 : vector<8x1xf32> to vector<8x128xf32>
    %78 = arith.addf %76, %77 : vector<8x128xf32>
    %cst_34 = arith.constant 0.000000e+00 : f32
    %79 = vector.broadcast %cst_34 : f32 to vector<8x128xf32>
    %80 = arith.cmpf oge, %78, %79 : vector<8x128xf32>
    %cst_35 = arith.constant 0.00999999977 : f32
    %81 = vector.broadcast %cst_35 : f32 to vector<8x128xf32>
    %82 = arith.mulf %81, %78 : vector<8x128xf32>
    %83 = arith.select %80, %78, %82 : vector<8x128xi1>, vector<8x128xf32>
    %c1_36 = arith.constant 1 : index
    %c0_37 = arith.constant 0 : index
    %c0_38 = arith.constant 0 : index
    %84 = vector.load %arg5[%c1_36, %c0_37, %c0_38] : memref<2x8x128xf32, #tpu.memory_space<vmem>>, vector<1x8x128xf32>
    %85 = vector.shape_cast %84 : vector<1x8x128xf32> to vector<8x128xf32>
    %86 = vector.shape_cast %83 : vector<8x128xf32> to vector<1x8x128xf32>
    tpu.vector_store %arg5[%c1_36, %c0_37, %c0_38], %86 {strides = array<i32>} : memref<2x8x128xf32, #tpu.memory_space<vmem>>, vector<1x8x128xf32>,
    return
  }
}

</mosaic_0001>

<bundles_post_ra>
// kernel: tpu_custom_call.1
= control target key start
LH: loop header
LB: loop body
LE: loop exit
PB: predicated region body
PF: predicated region fallthrough
CT: control target
= control target key end

     0   :  { %s330_s20 = smov 127   ;;  %s331_s21 = smov 1   ;;  %v332_v2 = vmov 0.0   ;;  %s397_s0 = inlined_call_operand.vmem [shape: f32[2,4,128], index: 0, kind: input, shape index: {}]   ;;  %s398_s1 = inlined_call_operand.vmem [shape: f32[8,12], index: 1, kind: input, shape index: {}]   ;;  %s399_s2 = inlined_call_operand.vmem [shape: f32[8,1], index: 2, kind: input, shape index: {}]   ;;  %s400_s3 = inlined_call_operand.vmem [shape: f32[8,1], index: 3, kind: input, shape index: {}]   ;;  %s401_s4 = inlined_call_operand.vmem [shape: f32[8,1], index: 4, kind: input, shape index: {}]   ;;  %s402_s5 = inlined_call_operand.hbm [shape: f32[2,8,128], index: 5, kind: output, shape index: {}]  }
   0x1   :  { %v27_v0 = vld [vmem:[%s397_s0] sm:$0xf]  ;;  %v273_v1 = vld [vmem:[%s397_s0 + $0x4] sm:$0xf]  ;;  %282 = vmatprep.subr.mxu0 %v332_v2  ;;  %289 = vmatprep.subr.mxu1 %v332_v2 }
   0x2   :  { %31 = vrot.lane.b32.xlu0 %v27_v0, %s330_s20  ;;  %28 = vrot.lane.b32.xlu1 %v27_v0, %s331_s21 }
   0x3   :  { %10 = vsyncpa [#allocation3], 0  ;;  %vm333_vm0 = vmmov 0   ;;  %v334_v3 = vmov 0   ;;  %v22_v4 = vld [vmem:[%s399_s2] sm:$0xff]  ;;  %v23_v5 = vlaneseq  ;;  %v35_v7 = vrot.slane %v27_v0, 4 }
   0x4   :  { %286 = vmatprep.mubr.msk.f32.mxu0 %vm333_vm0, %v332_v2  ;;  %293 = vmatprep.mubr.msk.f32.mxu1 %vm333_vm0, %v332_v2  ;;  %vm37_vm3 = vcmask 1043456   ;;  %v130_v12 = vrot.slane %v273_v1, 4  ;;  %v21_v14 = vld [vmem:[%s398_s1] sm:$0xff]  ;;  %vm44_vm4 = vcmask 97280   ;;  %s335_s29 = smov [#allocation2]  }
   0x5   :  { %304 = vset.pattern.permute.xlu0 %v334_v3  ;;  %305 = vset.pattern.permute.xlu1 %v334_v3  ;;  %v24_v6 = vand.u32 127, %v23_v5  ;;  %v227_v40 = vld [vmem:[%s400_s3] sm:$0xff]  ;;  %s260_s30 = sshll.u32 %s335_s29, 4  ;;  %s261_s30 = int_to_ptr.vmem [resolvable:$true] %s260_s30 }
   0x6   :  { %126 = vrot.lane.b32.xlu0 %v273_v1, %s330_s20  ;;  %123 = vrot.lane.b32.xlu1 %v273_v1, %s331_s21  ;;  %v229_v43 = vld [vmem:[%s401_s4] sm:$0xff]  ;;  %s308_s3 = scalar_lea.vmem %s261_s30, 256  ;;  %p313_p1 = scmp.lt.s32.totalorder %s261_s30, %s261_s30 }
   0x7   :  { %vm26_vm1 = vcmp.eq.s32.totalorder %v24_v6, 127  ;;  %vm25_vm2 = vcmp.eq.s32.totalorder %v24_v6, 0  ;;  %p309_p0 = scmp.ne.s32.totalorder %s261_s30, %s308_s3  ;;  %p314_p2 = scmp.lt.s32.totalorder %s308_s3, %s308_s3 }
   0x9   :  { %p315_p3 = por %p314_p2, %p313_p1 }
   0xa   :  { %41 = vperm.xlu0 %304, %v22_v4  }
   0xb   :  { %p316_p4 = pnand %p315_p3, %p309_p0 }
  0x74   :  { %v32_v8 = vpop.permute.xlu0 %31  ;;  %v29_v9 = vpop.permute.xlu1 %28 }
  0x75   :  { %v33_v10 = vsel %vm26_vm1, 0.0, %v32_v8  ;;  %v30_v11 = vsel %vm25_vm2, 0.0, %v29_v9 }
  0x76   :  { %283 = vmatpush3.msk.msra.mxu0 %vm37_vm3, %v33_v10  ;;  %v38_v13 = vsel %vm37_vm3, %v30_v11, %v35_v7 }
  0x77   :  { %284 = vmatprep.subr.mxu0 %v332_v2 }
  0x78   :  { %v127_v15 = vpop.permute.xlu0 %126  ;;  %285 = vmatpush3.msra.mxu0 %v38_v13  ;;  %v124_v16 = vpop.permute.xlu1 %123 }
  0x79   :  { %v128_v17 = vsel %vm26_vm1, 0.0, %v127_v15  ;;  %v125_v18 = vsel %vm25_vm2, 0.0, %v124_v16  ;;  %287 = vmatmul.mubr.msk.f32.vlgmr.msra.gmra.mxu0 %vm44_vm4, %v21_v14 }
  0x7a   :  { %290 = vmatpush3.msk.msra.mxu1 %vm37_vm3, %v128_v17  ;;  %v132_v19 = vsel %vm37_vm3, %v125_v18, %v130_v12 }
  0x7b   :  { %291 = vmatprep.subr.mxu1 %v332_v2 }
  0x7c   :  { %292 = vmatpush3.msra.mxu1 %v132_v19 }
  0x7d   :  { %294 = vmatmul.mubr.msk.f32.vlgmr.msra.gmra.mxu1 %vm44_vm4, %v21_v14 }
  0x85   :  { %v42_v20 = vpop.permute.xlu0 %41 }
 0x139   :  { %v117_v21 = vpop.f32.mrf.mxu0 }
 0x13a   :  { %v118_v22 = vadd.f32 %v117_v21, %v42_v20 }
 0x13b   :  { %v288_v23 = vpop.f32.mrf.mxu0 }
 0x13c   :  { %206 = vadd.xlane.f32.xlu1 %v118_v22 }
 0x13d   :  { %v202_v24 = vpop.f32.mrf.mxu1 }
 0x13e   :  { %v203_v25 = vadd.f32 %v202_v24, %v42_v20 }
 0x13f   :  { %v295_v26 = vpop.f32.mrf.mxu1 }
 0x140   :  { %209 = vadd.xlane.f32.xlu0 %v203_v25 }
 0x1c5   :  { %v207_v27 = vpop.xlane.xlu1 %206 }
 0x1c9   :  { %v210_v28 = vpop.xlane.xlu0 %209 }
 0x1ca   :  { %v211_v29 = vadd.f32 %v210_v28, %v207_v27 }
 0x1cc   :  { %v213_v30 = vmul.f32 0.00390625, %v211_v29 }
 0x1ce   :  { %v219_v31 = vsub.f32 %v203_v25, %v213_v30  ;;  %v214_v32 = vsub.f32 %v118_v22, %v213_v30 }
 0x1d0   :  { %v220_v33 = vmul.f32 %v219_v31, %v219_v31  ;;  %v215_v34 = vmul.f32 %v214_v32, %v214_v32 }
 0x1d2   :  { %221 = vadd.xlane.f32.xlu0 %v220_v33  ;;  %216 = vadd.xlane.f32.xlu1 %v215_v34 }
 0x25b   :  { %v222_v35 = vpop.xlane.xlu0 %221  ;;  %v217_v36 = vpop.xlane.xlu1 %216 }
 0x25c   :  { %v223_v37 = vadd.f32 %v222_v35, %v217_v36 }
 0x25e   :  { %v224_v38 = vmul.f32 0.00390625, %v223_v37 }
 0x260   :  { %v225_v39 = vadd.f32 1e-05, %v224_v38 }
 0x262   :  { %306 = vrsqrt.f32 %v225_v39 }
 0x26f   :  { %v307_v41 = vpop.eup %306 }
 0x270   :  { %v228_v42 = vmul.f32 %v307_v41, %v227_v40 }
 0x272   :  { %234 = vperm.xlu1 %305, %v228_v42   ;;  %v230_v44 = vmul.f32 %v228_v42, %v213_v30 }
 0x274   :  { %v231_v45 = vsub.f32 %v229_v43, %v230_v44 }
 0x276   :  { %240 = vperm.xlu0 %304, %v231_v45  }
 0x2ed   :  { %v235_v46 = vpop.permute.xlu1 %234 }
 0x2ee   :  { %v237_v47 = vmul.f32 %v235_v46, %v118_v22  ;;  %v248_v48 = vmul.f32 %v235_v46, %v203_v25 }
 0x2f1   :  { %v241_v49 = vpop.permute.xlu0 %240 }
 0x2f2   :  { %v243_v50 = vadd.f32 %v241_v49, %v237_v47  ;;  %v249_v51 = vadd.f32 %v248_v48, %v241_v49 }
 0x2f4   :  { %vm244_vm5 = vcmp.ge.f32.partialorder %v243_v50, 0.0  ;;  %v245_v52 = vmul.f32 0.01, %v243_v50  ;;  %vm250_vm6 = vcmp.ge.f32.partialorder %v249_v51, 0.0  ;;  %v251_v53 = vmul.f32 0.01, %v249_v51 }
 0x2f6   :  { %v246_v54 = vsel %vm244_vm5, %v243_v50, %v245_v52  ;;  %v252_v55 = vsel %vm250_vm6, %v249_v51, %v251_v53 }
 0x2f7   :  { %247 = vst [vmem:[#allocation2] sm:$0xff] %v246_v54  ;;  %254 = vst [vmem:[#allocation2 + $0x8] sm:$0xff] %v252_v55 }
 0x2f8   :  { %319 = shalt.err (!%p316_p4)
}
 0x2f9   :  { %s336_s4 = smov 128   ;;  %s337_s6 = smov 8  }
 0x2fa   :  { %266 = dma.vmem_to_hbm [thread:$0]  %s261_s30, 256, %s402_s5, [#allocation3], %s336_s4, %s336_s4, %s337_s6  }
 0x2fb   :  { %328 = dma.done.wait [#allocation3], 256  }
 0x2fc   :  { %329 = vsyncadd [#allocation3], 4294967040 }
 0x2fd   :  { %270 = vsyncpa [#allocation3], 1 }

</bundles_post_ra>
